<compile_context>
chip_gen: v5e
topology: v5e:2x2
jax: 0.10.0
libtpu: 0.0.40
codegen_flags: <defaults>
</compile_context>

<pallas_src>
import jax
import jax.numpy as jnp
from jax.experimental import pallas as pl
from jax.experimental.pallas import tpu as pltpu

_MIB = 1024 * 1024

# --------------------------------------------------------------------------- #
# Kernels
# --------------------------------------------------------------------------- #


def _rearrange_kernel(x_ref, o_ref):
    # x_ref block: (1, C_tile, L_tile) -> o_ref block: (1, L_tile, C_tile)
    # Pure XLU transpose of a lane-dense 2-D tile.
    o_ref[0] = x_ref[0].T


def _rearrange_pack_kernel(x_ref, o_ref):
    # x_ref block: (1, C, L_tile) -> o_ref block: (1, L_tile // f, f * C)
    # Transpose on the XLU, then fold f = (f*C)//C consecutive tokens into one
    # 128-lane output row so HBM writeback uses full-width (unmasked) stores.
    _, rows, lanes = o_ref.shape
    o_ref[0] = x_ref[0].T.reshape(rows, lanes)


# --------------------------------------------------------------------------- #
# Tiling helpers
# --------------------------------------------------------------------------- #


def _tpu_vmem_bytes() -> int:
    try:
        return int(pltpu.get_tpu_info().vmem_capacity_bytes)
    except Exception:
        return 64 * _MIB  # conservative: v7x per-TensorCore VMEM


def _block_budget_bytes(vmem_bytes: int) -> int:
    # 2 pipeline buffers x (input block + same-sized output block) = 4x budget.
    # Keep the whole pipeline <= ~1/4 of physical VMEM:
    #   128 MiB (v5e/v6e) -> 8 MiB blocks, 64 MiB (v7x) -> 4 MiB blocks.
    return max(1 * _MIB, min(8 * _MIB, vmem_bytes // 16))


def _pick_tile(total: int, align: int, max_elems: int) -> int:
    """Largest `align`-multiple tile <= max_elems, preferring exact divisors of
    `total`.  If `total` itself fits (or is below `align`), use the full dim —
    a block dim equal to the array dim is always a legal block shape."""
    if total <= align or total <= max_elems:
        return total
    best = max(align, (max_elems // align) * align)
    cand = best
    while cand >= align:
        if total % cand == 0:
            return cand
        cand -= align
    return best  # ragged tail; Pallas clips/masks the edge block


def _ensure_min_grid_steps(l_tile: int, L: int, B: int, align: int,
                           min_steps: int = 4) -> int:
    """Shrink l_tile (keeping alignment) until there are enough grid steps for
    double-buffering and for v7x's second TensorCore, when shapes allow it."""
    def n_steps(t):
        return B * (-(-L // t))

    while n_steps(l_tile) < min_steps:
        smaller = ((l_tile // 2) // align) * align
        if smaller < align or smaller >= l_tile:
            break
        l_tile = smaller
    return l_tile


# --------------------------------------------------------------------------- #
# pallas_call wrappers
# --------------------------------------------------------------------------- #


def _rearrange_general(x2, B, C, L, itemsize, budget, vmem_limit):
    # Optional channel split for very wide C so one block stays within the byte
    # budget. C_tile must be a multiple of 128 (input sublane + output lane).
    c_tile = C
    if C >= 256 and C * itemsize * 128 > budget:
        c_tile = _pick_tile(C, 128, max(128, budget // (128 * itemsize)))

    l_tile = _pick_tile(L, 128, max(128, budget // (c_tile * itemsize)))
    l_tile = _ensure_min_grid_steps(l_tile, L, B, 128)

    grid = (B, pl.cdiv(L, l_tile), pl.cdiv(C, c_tile))
    return pl.pallas_call(
        _rearrange_kernel,
        out_shape=jax.ShapeDtypeStruct((B, L, C), x2.dtype),
        grid_spec=pltpu.PrefetchScalarGridSpec(
            num_scalar_prefetch=0,
            grid=grid,
            in_specs=[
                pl.BlockSpec((1, c_tile, l_tile), lambda b, l, c: (b, c, l)),
            ],
            out_specs=pl.BlockSpec((1, l_tile, c_tile),
                                   lambda b, l, c: (b, l, c)),
        ),
        compiler_params=pltpu.CompilerParams(
            dimension_semantics=("parallel", "parallel", "parallel"),
            vmem_limit_bytes=vmem_limit,
        ),
        cost_estimate=pl.CostEstimate(
            flops=0, transcendentals=0,
            bytes_accessed=2 * B * C * L * itemsize,
        ),
    )(x2)


def _rearrange_packed(x2, B, C, L, f, itemsize, budget, vmem_limit):
    # Lane-dense output path for C | 128 (f = 128 // C).
    align = max(128, 8 * f)  # input lane dim (128) + output sublane dim (8*f)
    l_tile = _pick_tile(L, align, max(align, budget // (C * itemsize)))
    l_tile = _ensure_min_grid_steps(l_tile, L, B, align)

    grid = (B, pl.cdiv(L, l_tile))
    out = pl.pallas_call(
        _rearrange_pack_kernel,
        out_shape=jax.ShapeDtypeStruct((B, L // f, f * C), x2.dtype),
        grid_spec=pltpu.PrefetchScalarGridSpec(
            num_scalar_prefetch=0,
            grid=grid,
            in_specs=[
                pl.BlockSpec((1, C, l_tile), lambda b, l: (b, 0, l)),
            ],
            out_specs=pl.BlockSpec((1, l_tile // f, f * C),
                                   lambda b, l: (b, l, 0)),
        ),
        compiler_params=pltpu.CompilerParams(
            dimension_semantics=("parallel", "parallel"),
            vmem_limit_bytes=vmem_limit,
        ),
        cost_estimate=pl.CostEstimate(
            flops=0, transcendentals=0,
            bytes_accessed=2 * B * C * L * itemsize,
        ),
    )(x2)
    return out.reshape(B, L, C)  # metadata-only unfold of the lane packing


_PACK_SUPPORTED = None  # lazily determined: does the packed kernel lower here?


def einops_rearrange_b_c_thw_to_b_thw_c(x: jax.Array, *,
                                         block_budget_bytes: int | None = None
                                         ) -> jax.Array:
    """Pallas implementation of einops.rearrange(x, 'b c t h w -> b (t h w) c')."""
    global _PACK_SUPPORTED
    B, C, T, H, W = x.shape
    L = T * H * W
    itemsize = jnp.dtype(x.dtype).itemsize

    # Free (metadata-only) reshape: keep C as the sublane dim, L as the lane dim.
    x2 = x.reshape(B, C, L)

    vmem = _tpu_vmem_bytes()
    budget = (block_budget_bytes if block_budget_bytes is not None
              else _block_budget_bytes(vmem))
    vmem_limit = min(vmem * 3 // 4, 96 * _MIB)

    # Lane-dense output packing for narrow channel counts (C | 128).
    f = 128 // C if (0 < C < 128 and 128 % C == 0) else 1
    if f > 1 and L % f == 0 and _PACK_SUPPORTED is not False:
        try:
            out = _rearrange_packed(x2, B, C, L, f, itemsize, budget, vmem_limit)
            _PACK_SUPPORTED = True
            return out
        except Exception:
            # In-kernel fold (transpose + reshape) did not lower on this
            # backend; fall back to the plain transpose kernel (still correct,
            # just masked stores on the narrow-C output).
            _PACK_SUPPORTED = False

    return _rearrange_general(x2, B, C, L, itemsize, budget, vmem_limit)


# --------------------------------------------------------------------------- #
# Self-test
# --------------------------------------------------------------------------- #


def _reference(x):
    B, C, T, H, W = x.shape
    return jnp.transpose(x, (0, 2, 3, 4, 1)).reshape(B, T * H * W, C)


if __name__ == "__main__":
    key = jax.random.PRNGKey(0)
    k1, k2, k3 = jax.random.split(key, 3)

    # Case 1: narrow channels -> lane-dense packed output path.
    #   batch=2, channels=16, time=2, spatial 8x8 -> (2, 128, 16)
    x1 = jax.random.normal(k1, (2, 16, 2, 8, 8), dtype=jnp.float32)
    y1 = jax.block_until_ready(einops_rearrange_b_c_thw_to_b_thw_c(x1))
    assert y1.shape == (2, 128, 16) and y1.dtype == x1.dtype
    assert jnp.array_equal(y1, _reference(x1)), "case 1 mismatch"

    # Case 2: channels that do not divide 128 -> general transpose path.
    x2 = jax.random.normal(k2, (2, 48, 1, 8, 16), dtype=jnp.float32)
    y2 = jax.block_until_ready(einops_rearrange_b_c_thw_to_b_thw_c(x2))
    assert jnp.array_equal(y2, _reference(x2)), "case 2 mismatch"

    # Case 3: forced tiny block budget -> multi-block grid with a ragged tail
    # (exercises the edge-block masking the perf review flagged).
    x3 = jax.random.normal(k3, (1, 16, 2, 12, 24), dtype=jnp.float32)
    y3 = jax.block_until_ready(
        einops_rearrange_b_c_thw_to_b_thw_c(x3, block_budget_bytes=16 * 1024))
    assert jnp.array_equal(y3, _reference(x3)), "case 3 mismatch"

    print("KERNEL_OK")
</pallas_src>

<mosaic_0001>
module attributes {stable_mosaic.version = 11 : i64} {
  func.func @_rearrange_pack_kernel(%arg0: i32, %arg1: i32, %arg2: memref<1x16x128xf32, #tpu.memory_space<vmem>>, %arg3: memref<1x16x128xf32, #tpu.memory_space<vmem>>) attributes {dimension_semantics = [#tpu.dimension_semantics<parallel>, #tpu.dimension_semantics<parallel>], iteration_bounds = array<i64: 2, 1>, scalar_prefetch = 0 : i64, scratch_operands = 0 : i64, tpu.core_type = #tpu.core_type<tc>, window_params = [{transform_indices = @transform_0, window_bounds = array<i64: 1, 16, 128>}, {transform_indices = @transform_1, window_bounds = array<i64: 1, 16, 128>}]} {
    %c0 = arith.constant 0 : index
    %c0_0 = arith.constant 0 : index
    %c0_1 = arith.constant 0 : index
    %0 = vector.load %arg2[%c0, %c0_0, %c0_1] : memref<1x16x128xf32, #tpu.memory_space<vmem>>, vector<1x16x128xf32>
    %1 = vector.shape_cast %0 : vector<1x16x128xf32> to vector<16x128xf32>
    %2 = tpu.transpose %1, [1, 0] : vector<16x128xf32> -> vector<128x16xf32>
    %3 = vector.shape_cast %2 : vector<128x16xf32> to vector<16x128xf32>
    %c0_2 = arith.constant 0 : index
    %c0_3 = arith.constant 0 : index
    %c0_4 = arith.constant 0 : index
    %4 = vector.load %arg3[%c0_2, %c0_3, %c0_4] : memref<1x16x128xf32, #tpu.memory_space<vmem>>, vector<1x16x128xf32>
    %5 = vector.shape_cast %4 : vector<1x16x128xf32> to vector<16x128xf32>
    %6 = vector.shape_cast %3 : vector<16x128xf32> to vector<1x16x128xf32>
    tpu.vector_store %arg3[%c0_2, %c0_3, %c0_4], %6 {strides = array<i32>} : memref<1x16x128xf32, #tpu.memory_space<vmem>>, vector<1x16x128xf32>,
    return
  }
  func.func @transform_0(%arg0: i32, %arg1: i32) -> (i32, i32, i32) {
    %c0_i32 = arith.constant 0 : i32
    %c0_i32_0 = arith.constant 0 : i32
    return %arg0, %c0_i32, %arg1 : i32, i32, i32
  }
  func.func @transform_1(%arg0: i32, %arg1: i32) -> (i32, i32, i32) {
    %c0_i32 = arith.constant 0 : i32
    %c0_i32_0 = arith.constant 0 : i32
    return %arg0, %arg1, %c0_i32 : i32, i32, i32
  }
}

module attributes {stable_mosaic.version = 11 : i64} {
  func.func @_rearrange_kernel(%arg0: i32, %arg1: i32, %arg2: i32, %arg3: memref<1x16x128xf32, #tpu.memory_space<vmem>>, %arg4: memref<1x128x16xf32, #tpu.memory_space<vmem>>) attributes {dimension_semantics = [#tpu.dimension_semantics<parallel>, #tpu.dimension_semantics<parallel>, #tpu.dimension_semantics<parallel>], iteration_bounds = array<i64: 2, 1, 1>, scalar_prefetch = 0 : i64, scratch_operands = 0 : i64, tpu.core_type = #tpu.core_type<tc>, window_params = [{transform_indices = @transform_0, window_bounds = array<i64: 1, 16, 128>}, {transform_indices = @transform_1, window_bounds = array<i64: 1, 128, 16>}]} {
    %c0 = arith.constant 0 : index
    %c0_0 = arith.constant 0 : index
    %c0_1 = arith.constant 0 : index
    %0 = vector.load %arg3[%c0, %c0_0, %c0_1] : memref<1x16x128xf32, #tpu.memory_space<vmem>>, vector<1x16x128xf32>
    %1 = vector.shape_cast %0 : vector<1x16x128xf32> to vector<16x128xf32>
    %2 = tpu.transpose %1, [1, 0] : vector<16x128xf32> -> vector<128x16xf32>
    %c0_2 = arith.constant 0 : index
    %c0_3 = arith.constant 0 : index
    %c0_4 = arith.constant 0 : index
    %3 = vector.load %arg4[%c0_2, %c0_3, %c0_4] : memref<1x128x16xf32, #tpu.memory_space<vmem>>, vector<1x128x16xf32>
    %4 = vector.shape_cast %3 : vector<1x128x16xf32> to vector<128x16xf32>
    %5 = vector.shape_cast %2 : vector<128x16xf32> to vector<1x128x16xf32>
    tpu.vector_store %arg4[%c0_2, %c0_3, %c0_4], %5 {strides = array<i32>} : memref<1x128x16xf32, #tpu.memory_space<vmem>>, vector<1x128x16xf32>,
    return
  }
  func.func @transform_0(%arg0: i32, %arg1: i32, %arg2: i32) -> (i32, i32, i32) {
    %c0_i32 = arith.constant 0 : i32
    return %arg0, %arg2, %arg1 : i32, i32, i32
  }
  func.func @transform_1(%arg0: i32, %arg1: i32, %arg2: i32) -> (i32, i32, i32) {
    %c0_i32 = arith.constant 0 : i32
    return %arg0, %arg1, %arg2 : i32, i32, i32
  }
}

</mosaic_0001>

<bundles_post_ra>
// kernel: tpu_custom_call.1
= control target key start
LH: loop header
LB: loop body
LE: loop exit
PB: predicated region body
PF: predicated region fallthrough
CT: control target
= control target key end

     0   :  { %6 = vsyncpa [#allocation3], 0  ;;  %s634_s0 = inlined_call_operand.hbm [shape: f32[2,16,128], index: 0, kind: input, shape index: {}]   ;;  %s635_s1 = inlined_call_operand.vmem [shape: f32[2,128,16], index: 1, kind: output, shape index: {}]  }
   0x1   :  { %8 = vsyncpa [#allocation3 + $0x1], 0  ;;  %s512_s6 = smov 0   ;;  %s514_s7 = smov 0  }
   0x2   :  { %s516_s8 = smov 0   ;;  %s518_s9 = smov 0  }
   0x3   :  { %s520_s10 = smov 0   ;;  %s522_s11 = smov 0  }
   0x4 LB: > { %s345_s12 = sadd.s32 4294967295, %s498_s11   ;;  %s33_s13 = sadd.s32 1, %s494_s10  ;;  %s498_s11 = sphi %s522_s11, %s14_s11   ;;  %s494_s10 = sphi %s520_s10, %s642_s10   ;;  %s490_s9 = sphi %s518_s9, %s641_s9   ;;  %s486_s8 = sphi %s516_s8, %s640_s8   ;;  %s482_s7 = sphi %s514_s7, %s639_s7   ;;  %s478_s6 = sphi %s512_s6, %s638_s6  }
   0x5   : > { %p35_p0 = scmp.ge.s32.totalorder %s33_s13, 2  ;;  %s44_s14 = sadd.s32 1, %s486_s8 }
   0x6   : > { %p51_p1 = scmp.ne.s32.totalorder %s486_s8, %s482_s7  ;;  %p52_p2 = scmp.eq.s32.totalorder %s498_s11, 0 }
   0x7   : > { %s644_s13 = smov (%p35_p0, %s33_s13), 0  ;;  %p57_p4 = scmp.ne.s32.totalorder %s482_s7, %s478_s6 }
   0x8   : > { %p548_p3 = por %p52_p2, %p51_p1  ;;  %s37_s16 = ssub.s32 %s494_s10, %s644_s13 }
   0x9   : > { %p58_p5 = scmp.eq.s32.totalorder %s345_s12, 0  ;;  %p42_p6 = scmp.eq.s32.totalorder %s37_s16, 0 }
   0xa   : > { %p366_p8 = scmp.lt.s32.totalorder %s498_s11, 2  ;;  %s111_s19 = sand.u32 1, %s486_s8  }
   0xb   : > { %p555_p7 = por %p58_p5, %p57_p4  ;;  %s358_s20 = sshll.u32 %s494_s10, 4 }
   0xc   : > { %s561_s18 = scalar_select %p42_p6, %s486_s8, %s44_s14  }
   0xd   : > { %s349_s21 = sshll.u32 %s111_s19, 4  ;;  %s123_s24 = scalar_lea.hbm %s634_s0, %s358_s20 }
   0xe   : > { %s124_s25 = sshll.u32 %s123_s24, 4  ;;  %s115_s26 = scalar_lea.vmem [#allocation2], %s349_s21  ;;  %s125_s25 = int_to_ptr.hbm [resolvable:$true] %s124_s25 }
   0xf   : > { %s126_s27 = sshll.u32 %s115_s26, 4  ;;  %p363_p9 = pnand %p366_p8, %p548_p3  ;;  %s127_s27 = int_to_ptr.vmem [resolvable:$true] %s126_s27 }
  0x10   : > { %p352_p10 = scmp.ge.s32.totalorder %s498_s11, 1  ;;  %p134_p11 = scmp.lt.s32.totalorder %s498_s11, 3 }
  0x11   : > { %s112_s28 = scalar_lea.sflag [#allocation3], %s111_s19  ;;  %s500_s29 = smov 128  }
  0x12   : > { %s501_s30 = smov 8   ;;  %p135_p12 = pnand %p352_p10, %p134_p11 }
  0x13   : > { %365 = dma.hbm_to_vmem [thread:$0]  (!%p363_p9), %s125_s25, 256, %s127_s27, %s112_s28, %s500_s29, %s500_s29, %s501_s30  }
  0x14   : > { %138 = sbr.rel (%p135_p12) target bundleno = 313 (0x139), region = 24  ;;  %s140_s2 = sand.u32 (!%p135_p12), 1, %s482_s7  }
  0x15   : > { %s353_s3 = sshll.u32 (!%p135_p12), %s140_s2, 4  ;;  %s141_s4 = scalar_lea.sflag (!%p135_p12), [#allocation3], %s140_s2 }
  0x16   : > { %s144_s5 = scalar_lea.vmem (!%p135_p12), [#allocation2], %s353_s3 }
  0x19   : > { %473 = dma.done.wait (%p555_p7), %s141_s4, 256  }
  0x1a   : > { %475 = vsyncadd (%p555_p7), %s141_s4, 4294967040  ;;  %v185_v0 = vld [vmem:[%s144_s5] sm:$0xff]  ;;  %v186_v1 = vld [vmem:[%s144_s5 + $0x8] sm:$0xff]  ;;  %p173_p13 = scmp.lt.s32.totalorder %s490_s9, 1  ;;  %vm219_vm0 = vcmask 130048  }
  0x1b   : > { %187 = vxpose.xlu0.b32.start [1/2] (short) %v185_v0, 128 }
  0x1c   : > { %s646_s9 = smov (!%p173_p13, %s490_s9), 1 }
  0x1d   : > { %s359_s6 = sshll.u32 %s646_s9, 7 }
  0x1e   : > { %s582_s15 = scalar_lea.vmem %s635_s1, %s359_s6 }
  0x23   : > { %188 = vxpose.xlu0.b32.end [2/2] (short) %v186_v1, 128 }
  0xbf   : > { %v203_v2 = vpop.trf.xlu0 }
  0xc0   : > { %220 = vst.msk [vmem:[%s582_s15] sm:$0xff] %vm219_vm0, %v203_v2 }
  0xc7   : > { %v204_v3 = vpop.trf.xlu0 }
  0xc8   : > { %221 = vst.msk [vmem:[%s582_s15 + $0x8] sm:$0xff] %vm219_vm0, %v204_v3 }
  0xcf   : > { %v205_v4 = vpop.trf.xlu0 }
  0xd0   : > { %222 = vst.msk [vmem:[%s582_s15 + $0x10] sm:$0xff] %vm219_vm0, %v205_v4 }
  0xd7   : > { %v206_v5 = vpop.trf.xlu0 }
  0xd8   : > { %223 = vst.msk [vmem:[%s582_s15 + $0x18] sm:$0xff] %vm219_vm0, %v206_v5 }
  0xdf   : > { %v207_v6 = vpop.trf.xlu0 }
  0xe0   : > { %224 = vst.msk [vmem:[%s582_s15 + $0x20] sm:$0xff] %vm219_vm0, %v207_v6 }
  0xe7   : > { %v208_v7 = vpop.trf.xlu0 }
  0xe8   : > { %225 = vst.msk [vmem:[%s582_s15 + $0x28] sm:$0xff] %vm219_vm0, %v208_v7 }
  0xef   : > { %v209_v8 = vpop.trf.xlu0 }
  0xf0   : > { %226 = vst.msk [vmem:[%s582_s15 + $0x30] sm:$0xff] %vm219_vm0, %v209_v8 }
  0xf7   : > { %v210_v9 = vpop.trf.xlu0 }
  0xf8   : > { %227 = vst.msk [vmem:[%s582_s15 + $0x38] sm:$0xff] %vm219_vm0, %v210_v9 }
  0xff   : > { %v211_v10 = vpop.trf.xlu0 }
 0x100   : > { %228 = vst.msk [vmem:[%s582_s15 + $0x40] sm:$0xff] %vm219_vm0, %v211_v10 }
 0x107   : > { %v212_v11 = vpop.trf.xlu0 }
 0x108   : > { %229 = vst.msk [vmem:[%s582_s15 + $0x48] sm:$0xff] %vm219_vm0, %v212_v11 }
 0x10f   : > { %v213_v12 = vpop.trf.xlu0 }
 0x110   : > { %230 = vst.msk [vmem:[%s582_s15 + $0x50] sm:$0xff] %vm219_vm0, %v213_v12 }
 0x117   : > { %v214_v13 = vpop.trf.xlu0 }
 0x118   : > { %231 = vst.msk [vmem:[%s582_s15 + $0x58] sm:$0xff] %vm219_vm0, %v214_v13 }
 0x11f   : > { %v215_v14 = vpop.trf.xlu0 }
 0x120   : > { %232 = vst.msk [vmem:[%s582_s15 + $0x60] sm:$0xff] %vm219_vm0, %v215_v14 }
 0x127   : > { %v216_v15 = vpop.trf.xlu0 }
 0x128   : > { %233 = vst.msk [vmem:[%s582_s15 + $0x68] sm:$0xff] %vm219_vm0, %v216_v15 }
 0x12f   : > { %v217_v16 = vpop.trf.xlu0 }
 0x130   : > { %234 = vst.msk [vmem:[%s582_s15 + $0x70] sm:$0xff] %vm219_vm0, %v217_v16 }
 0x137   : > { %v218_v17 = vpop.trf.xlu0 }
 0x138   : > { %235 = vst.msk [vmem:[%s582_s15 + $0x78] sm:$0xff] %vm219_vm0, %v218_v17 }
 0x139 PF: > { %s14_s11 = sadd.s32 1, %s498_s11   ;;  %s638_s6 = smov %s482_s7 }
 0x13a   : > { %p11_p0 = scmp.ge.s32.totalorder %s14_s11, 4   ;;  %s639_s7 = smov %s486_s8 }
 0x13b   : > { %s640_s8 = smov %s561_s18  ;;  %s641_s9 = smov %s494_s10 }
 0x13c   : > { %s642_s10 = smov %s644_s13  ;;  %13 = sbr.rel (!%p11_p0) target bundleno = 4 (0x4), region = 64 }
 0x141   :  { %272 = vsyncpa [#allocation3], 1 }
 0x142   :  { %274 = vsyncpa [#allocation3 + $0x1], 1 }

</bundles_post_ra>
